<compile_context>
chip_gen: v7x
topology: tpu7x:2x2x1
jax: 0.10.0
libtpu: 0.0.40
codegen_flags: <defaults>
</compile_context>

<pallas_src>
import functools

import jax
import jax.numpy as jnp
from jax.experimental import pallas as pl
from jax.experimental.pallas import tpu as pltpu


def _round_up(a, b):
    return (a + b - 1) // b * b


def _cdiv(a, b):
    return (a + b - 1) // b


def masked_mae_kernel(x_ref, w_ref, b_ref, m_ref, e_ref, out_ref, acc_ref):
    """One grid step handles a (tm, Hp) tile of packed tokens.

    x_ref  : (tm, Hp)   packed token tile (input dtype, bf16 stays bf16)
    w_ref  : (Hp, Hp)   kron(I_G, W.T) in the input dtype (resident)
    b_ref  : (1, Hp)    tiled projection bias, f32 (resident)
    m_ref  : (tm, Gm)   per-token {0,1} mask columns, bf16 (padded rows are 0)
    e_ref  : (Gm, Hp)   constant 0/1 lane-expansion matrix, bf16 (resident)
    out_ref: (1, 1, Hp) per-chunk lane partial sums (written once per chunk)
    acc_ref: (tm, Hp)   f32 VMEM accumulator, persists across the inner axis
    """
    i = pl.program_id(1)                       # inner (reduction) axis

    x = x_ref[...]
    # Dtype-matched MXU matmul (bf16xbf16 or f32xf32), f32 accumulate.
    d = jnp.dot(x, w_ref[...], preferred_element_type=jnp.float32)
    # recon - x in f32; identity kept out of W so bf16 weights stay accurate.
    d = d + b_ref[...] - x.astype(jnp.float32)
    # Lane-expand the per-token mask via a tiny MXU dot (m @ E): m_exp[t, l]
    # equals the mask of the token owning lane l.
    m_exp = jnp.dot(m_ref[...], e_ref[...], preferred_element_type=jnp.float32)
    contrib = jnp.abs(d) * m_exp

    @pl.when(i == 0)
    def _():
        acc_ref[...] = contrib                 # fused init (no zero pass)

    @pl.when(i > 0)
    def _():
        acc_ref[...] += contrib

    @pl.when(i == pl.num_programs(1) - 1)
    def _():
        # Single cross-sublane reduction per chunk; lanes (Hp) stay dense.
        out_ref[...] = jnp.sum(acc_ref[...], axis=0, keepdims=True)[None]


def _masked_abs_sums(x_packed, w_packed, b_packed, mask_cols, expand, *, tm,
                     blocks_per_chunk, num_chunks, vmem_limit,
                     single_buffer_resident):
    _, Hp = x_packed.shape
    Gm = mask_cols.shape[1]

    resident_kwargs = {}
    if single_buffer_resident:
        # Constant index_map -> no refetch needed; single-buffer the resident
        # weight/bias/expand so a large-Hp weight does not cost 2x VMEM.
        resident_kwargs = dict(pipeline_mode=pl.Buffered(1))

    grid = (num_chunks, blocks_per_chunk)
    return pl.pallas_call(
        masked_mae_kernel,
        out_shape=jax.ShapeDtypeStruct((num_chunks, 1, Hp), jnp.float32),
        grid=grid,
        in_specs=[
            pl.BlockSpec((tm, Hp), lambda c, i: (c * blocks_per_chunk + i, 0)),
            pl.BlockSpec((Hp, Hp), lambda c, i: (0, 0), **resident_kwargs),
            pl.BlockSpec((1, Hp), lambda c, i: (0, 0), **resident_kwargs),
            pl.BlockSpec((tm, Gm), lambda c, i: (c * blocks_per_chunk + i, 0)),
            pl.BlockSpec((Gm, Hp), lambda c, i: (0, 0), **resident_kwargs),
        ],
        out_specs=pl.BlockSpec((1, 1, Hp), lambda c, i: (c, 0, 0)),
        scratch_shapes=[pltpu.VMEM((tm, Hp), jnp.float32)],
        compiler_params=pltpu.CompilerParams(
            dimension_semantics=("parallel", "arbitrary"),
            vmem_limit_bytes=vmem_limit),
    )(x_packed, w_packed, b_packed, mask_cols, expand)


def masked_mae_loss(hidden_states, weight, bias, *, mask_ratio=0.25,
                    mask_key=None, tm=None, num_chunks=1):
    """JAX wrapper reproducing MaskedMAE.forward.

    hidden_states: (B, T, H) float32 / bfloat16
    weight       : (H, H) PyTorch Linear weight (out_features, in_features)
    bias         : (H,)   PyTorch Linear bias
    num_chunks   : number of "parallel" chunks; keep 1 on single-TC parts
                   (v5e/v6e), use an even number (e.g. 2) on v7x megacore.
    """
    B, T, H = hidden_states.shape
    M = B * T

    if mask_key is None:
        mask_key = jax.random.PRNGKey(0)

    # torch.rand(B, T) < mask_ratio  ->  statistically equivalent JAX mask.
    # TODO(synk): not bit-identical to torch.rand for a fixed seed.
    mask_bt = jax.random.uniform(mask_key, (B, T)) < mask_ratio

    x2d = hidden_states.reshape(M, H)
    mask1d = mask_bt.reshape(M)
    x_dtype = x2d.dtype
    x_bytes = jnp.dtype(x_dtype).itemsize

    # ---- pack G tokens per 128-lane row so lanes / MXU columns are full ----
    G = max(1, 128 // H)
    Hp = G * H
    Gm = _round_up(max(G, 8), 8)          # padded K dim of the mask-expand dot

    Mp = _round_up(M, G)
    if Mp != M:
        x2d = jnp.pad(x2d, ((0, Mp - M), (0, 0)))
        mask1d = jnp.pad(mask1d, (0, Mp - M))
    Mg = Mp // G
    x_packed = x2d.reshape(Mg, Hp)                      # contiguous -> free
    mask_cols = jnp.pad(mask1d.reshape(Mg, G).astype(jnp.bfloat16),
                        ((0, 0), (0, Gm - G)))

    # Block-diagonal weight kron(I_G, W.T) cast to the INPUT dtype so the MXU
    # runs at native rate; bias tiled and kept f32 (added post-accumulate).
    wT = weight.T
    w_packed = wT if G == 1 else jnp.kron(jnp.eye(G, dtype=wT.dtype), wT)
    w_packed = w_packed.astype(x_dtype)
    b_packed = jnp.tile(bias.astype(jnp.float32), G).reshape(1, Hp)

    # Constant lane-expansion matrix: expand[g, l] = 1 iff lane l belongs to
    # packed-token slot g (rows >= G are zero padding).
    lane_group = jnp.arange(Hp) // H
    expand = (lane_group[None, :] == jnp.arange(Gm)[:, None]).astype(jnp.bfloat16)

    # ---- tile sizing: biggest tm that fits a conservative VMEM budget ----
    if tm is None:
        budget = 24 << 20                                  # safe on v5e/v6e/v7x
        fixed = (2 * Hp * Hp * x_bytes + 2 * Hp * 4 + 2 * Gm * Hp * 2
                 + 2 * Hp * 4)
        per_row = 2 * Hp * x_bytes + 2 * Gm * 2 + Hp * 4
        tm = max(8, min((budget - fixed) // per_row, 1024))
    tm = int(max(8, _round_up(min(int(tm), max(Mg, 8)), 8)))

    num_blocks = _cdiv(Mg, tm)
    num_chunks = int(max(1, min(int(num_chunks), num_blocks)))
    blocks_per_chunk = _cdiv(num_blocks, num_chunks)
    padded_Mg = num_chunks * blocks_per_chunk * tm
    if padded_Mg != Mg:
        pad = padded_Mg - Mg
        x_packed = jnp.pad(x_packed, ((0, pad), (0, 0)))
        mask_cols = jnp.pad(mask_cols, ((0, pad), (0, 0)))   # padded rows -> 0

    # VMEM limit derived from the actual footprint (+margin); never request the
    # full physical VMEM (v7x only has 64 MiB per TensorCore).
    footprint = (2 * tm * Hp * x_bytes + 2 * tm * Gm * 2
                 + 2 * Hp * Hp * x_bytes + 2 * Hp * 4 + 2 * Gm * Hp * 2
                 + tm * Hp * 4 + 2 * Hp * 4)
    vmem_limit = int(max(16 << 20, min(footprint * 3 // 2 + (4 << 20), 48 << 20)))

    call = functools.partial(
        _masked_abs_sums, x_packed, w_packed, b_packed, mask_cols, expand,
        tm=tm, blocks_per_chunk=blocks_per_chunk, num_chunks=num_chunks,
        vmem_limit=vmem_limit)
    if hasattr(pl, "Buffered"):
        try:
            partials = call(single_buffer_resident=True)
        except Exception:
            # Fallback if this JAX build rejects pl.Buffered(1) on a BlockSpec.
            partials = call(single_buffer_resident=False)
    else:
        partials = call(single_buffer_resident=False)

    total = jnp.sum(partials)                      # sum per-chunk lane partials
    num_masked = jnp.sum(mask_bt.astype(jnp.float32))
    denom = num_masked * jnp.float32(H)
    loss = jnp.where(num_masked > 0, total / jnp.maximum(denom, 1.0),
                     jnp.float32(0.0))
    return loss, mask_bt


def reference_loss(hidden_states, weight, bias, mask_bt):
    """Plain-JAX reference mirroring the PyTorch module (for sanity checking)."""
    B, T, H = hidden_states.shape
    x = hidden_states.reshape(B * T, H).astype(jnp.float32)
    m = mask_bt.reshape(B * T).astype(jnp.float32)
    recon = x @ weight.astype(jnp.float32).T + bias.astype(jnp.float32)
    diff = jnp.abs(recon - x)
    num = jnp.sum(m)
    return jnp.where(num > 0, jnp.sum(diff * m[:, None]) / (num * H), 0.0)


if __name__ == "__main__":
    key = jax.random.PRNGKey(0)

    # --- 1) small shape from the module spec: batch=2, seq=8, hidden=32 ------
    #     (H=32 exercises the G=4 lane-packing path)
    B, T, H = 2, 8, 32
    k_x, k_w, k_b, k_mask, key = jax.random.split(key, 5)
    hidden_states = jax.random.normal(k_x, (B, T, H), dtype=jnp.float32)
    bound = 1.0 / jnp.sqrt(H)
    weight = jax.random.uniform(k_w, (H, H), minval=-bound, maxval=bound,
                                dtype=jnp.float32)
    bias = jax.random.uniform(k_b, (H,), minval=-bound, maxval=bound,
                              dtype=jnp.float32)

    loss, mask_bt = masked_mae_loss(hidden_states, weight, bias,
                                    mask_ratio=0.25, mask_key=k_mask)
    loss = jax.block_until_ready(loss)
    ref = reference_loss(hidden_states, weight, bias, mask_bt)
    assert jnp.allclose(loss, ref, atol=1e-5, rtol=1e-4), (loss, ref)

    # --- 2) ragged shape: padding, multi-step reduction, 2-chunk parallel axis
    B2, T2, H2 = 3, 100, 32
    k_x2, k_w2, k_b2, k_m2, key = jax.random.split(key, 5)
    hs2 = jax.random.normal(k_x2, (B2, T2, H2), dtype=jnp.float32)
    bound2 = 1.0 / jnp.sqrt(H2)
    w2 = jax.random.uniform(k_w2, (H2, H2), minval=-bound2, maxval=bound2,
                            dtype=jnp.float32)
    b2 = jax.random.uniform(k_b2, (H2,), minval=-bound2, maxval=bound2,
                            dtype=jnp.float32)
    loss2, mask2 = masked_mae_loss(hs2, w2, b2, mask_ratio=0.25, mask_key=k_m2,
                                   tm=16, num_chunks=2)
    loss2 = jax.block_until_ready(loss2)
    ref2 = reference_loss(hs2, w2, b2, mask2)
    assert jnp.allclose(loss2, ref2, atol=1e-5, rtol=1e-4), (loss2, ref2)

    # --- 3) H=128 exercises the unpacked (G=1) path + multi-step reduction ---
    B3, T3, H3 = 2, 64, 128
    k_x3, k_w3, k_b3, k_m3, key = jax.random.split(key, 5)
    hs3 = jax.random.normal(k_x3, (B3, T3, H3), dtype=jnp.float32)
    bound3 = 1.0 / jnp.sqrt(H3)
    w3 = jax.random.uniform(k_w3, (H3, H3), minval=-bound3, maxval=bound3,
                            dtype=jnp.float32)
    b3 = jax.random.uniform(k_b3, (H3,), minval=-bound3, maxval=bound3,
                            dtype=jnp.float32)
    loss3, mask3 = masked_mae_loss(hs3, w3, b3, mask_ratio=0.25, mask_key=k_m3,
                                   tm=32, num_chunks=1)
    loss3 = jax.block_until_ready(loss3)
    ref3 = reference_loss(hs3, w3, b3, mask3)
    assert jnp.allclose(loss3, ref3, atol=1e-5, rtol=1e-4), (loss3, ref3)

    # --- 4) bf16 activations: dtype-matched (bf16 x bf16) MXU path -----------
    hs4 = hs2.astype(jnp.bfloat16)
    loss4, mask4 = masked_mae_loss(hs4, w2, b2, mask_ratio=0.25, mask_key=k_m2,
                                   tm=24, num_chunks=2)
    loss4 = jax.block_until_ready(loss4)
    ref4 = reference_loss(hs4.astype(jnp.float32),
                          w2.astype(jnp.bfloat16).astype(jnp.float32),
                          b2, mask4)
    assert jnp.allclose(loss4, ref4, atol=2e-3, rtol=2e-2), (loss4, ref4)

    print("KERNEL_OK")
</pallas_src>

<mosaic_0001>
module attributes {stable_mosaic.version = 11 : i64} {
  func.func @masked_mae_kernel(%arg0: i32, %arg1: i32, %arg2: memref<8x128xf32, #tpu.memory_space<vmem>>, %arg3: memref<128x128xf32, #tpu.memory_space<vmem>>, %arg4: memref<1x128xf32, #tpu.memory_space<vmem>>, %arg5: memref<8x8xbf16, #tpu.memory_space<vmem>>, %arg6: memref<8x128xbf16, #tpu.memory_space<vmem>>, %arg7: memref<1x1x128xf32, #tpu.memory_space<vmem>>, %arg8: memref<8x128xf32, #tpu.memory_space<vmem>>) attributes {dimension_semantics = [#tpu.dimension_semantics<parallel>, #tpu.dimension_semantics<arbitrary>], iteration_bounds = array<i64: 1, 1>, scalar_prefetch = 0 : i64, scratch_operands = 1 : i64, tpu.core_type = #tpu.core_type<tc>, window_params = [{transform_indices = @transform_0, window_bounds = array<i64: 8, 128>}, {pipeline_mode = #tpu.pipeline_mode<synchronous>, transform_indices = @transform_1, window_bounds = array<i64: 128, 128>}, {pipeline_mode = #tpu.pipeline_mode<synchronous>, transform_indices = @transform_2, window_bounds = array<i64: 1, 128>}, {transform_indices = @transform_3, window_bounds = array<i64: 8, 8>}, {pipeline_mode = #tpu.pipeline_mode<synchronous>, transform_indices = @transform_4, window_bounds = array<i64: 8, 128>}, {transform_indices = @transform_5, window_bounds = array<i64: 1, 1, 128>}]} {
    %c0 = arith.constant 0 : index
    %c0_0 = arith.constant 0 : index
    %0 = vector.load %arg2[%c0, %c0_0] : memref<8x128xf32, #tpu.memory_space<vmem>>, vector<8x128xf32>
    %c0_1 = arith.constant 0 : index
    %c0_2 = arith.constant 0 : index
    %1 = vector.load %arg3[%c0_1, %c0_2] : memref<128x128xf32, #tpu.memory_space<vmem>>, vector<128x128xf32>
    %cst = arith.constant dense<0.000000e+00> : vector<8x128xf32>
    %2 = tpu.matmul %0, %1, %cst {dimension_numbers = #tpu.dot_dimension_numbers<[1], [0], [0], [1], [0, 0, 1, 1], [], []>} : vector<8x128xf32>, vector<128x128xf32>, vector<8x128xf32> -> vector<8x128xf32>
    %c0_3 = arith.constant 0 : index
    %c0_4 = arith.constant 0 : index
    %3 = vector.load %arg4[%c0_3, %c0_4] : memref<1x128xf32, #tpu.memory_space<vmem>>, vector<1x128xf32>
    %4 = vector.broadcast %3 : vector<1x128xf32> to vector<8x128xf32>
    %5 = arith.addf %2, %4 : vector<8x128xf32>
    %6 = arith.subf %5, %0 : vector<8x128xf32>
    %c0_5 = arith.constant 0 : index
    %c0_6 = arith.constant 0 : index
    %7 = vector.load %arg5[%c0_5, %c0_6] : memref<8x8xbf16, #tpu.memory_space<vmem>>, vector<8x8xbf16>
    %c0_7 = arith.constant 0 : index
    %c0_8 = arith.constant 0 : index
    %8 = vector.load %arg6[%c0_7, %c0_8] : memref<8x128xbf16, #tpu.memory_space<vmem>>, vector<8x128xbf16>
    %cst_9 = arith.constant dense<0.000000e+00> : vector<8x128xf32>
    %9 = tpu.matmul %7, %8, %cst_9 {dimension_numbers = #tpu.dot_dimension_numbers<[1], [0], [0], [1], [0, 0, 1, 1], [], []>} : vector<8x8xbf16>, vector<8x128xbf16>, vector<8x128xf32> -> vector<8x128xf32>
    %10 = math.absf %6 : vector<8x128xf32>
    %11 = arith.mulf %10, %9 : vector<8x128xf32>
    %c0_i32 = arith.constant 0 : i32
    %12 = arith.cmpi eq, %arg1, %c0_i32 : i32
    %13 = arith.extui %12 : i1 to i32
    %c0_i32_10 = arith.constant 0 : i32
    %14 = arith.cmpi ne, %13, %c0_i32_10 : i32
    scf.if %14 {
      %c0_15 = arith.constant 0 : index
      %c0_16 = arith.constant 0 : index
      %21 = vector.load %arg8[%c0_15, %c0_16] : memref<8x128xf32, #tpu.memory_space<vmem>>, vector<8x128xf32>
      tpu.vector_store %arg8[%c0_15, %c0_16], %11 {strides = array<i32>} : memref<8x128xf32, #tpu.memory_space<vmem>>, vector<8x128xf32>,
    } else {
    }
    %c0_i32_11 = arith.constant 0 : i32
    %15 = arith.cmpi sgt, %arg1, %c0_i32_11 : i32
    %16 = arith.extui %15 : i1 to i32
    %c0_i32_12 = arith.constant 0 : i32
    %17 = arith.cmpi ne, %16, %c0_i32_12 : i32
    scf.if %17 {
      %c0_15 = arith.constant 0 : index
      %c0_16 = arith.constant 0 : index
      %21 = vector.load %arg8[%c0_15, %c0_16] : memref<8x128xf32, #tpu.memory_space<vmem>>, vector<8x128xf32>
      %22 = arith.addf %21, %11 : vector<8x128xf32>
      %c0_17 = arith.constant 0 : index
      %c0_18 = arith.constant 0 : index
      %23 = vector.load %arg8[%c0_17, %c0_18] : memref<8x128xf32, #tpu.memory_space<vmem>>, vector<8x128xf32>
      tpu.vector_store %arg8[%c0_17, %c0_18], %22 {strides = array<i32>} : memref<8x128xf32, #tpu.memory_space<vmem>>, vector<8x128xf32>,
    } else {
    }
    %c0_i32_13 = arith.constant 0 : i32
    %18 = arith.cmpi eq, %arg1, %c0_i32_13 : i32
    %19 = arith.extui %18 : i1 to i32
    %c0_i32_14 = arith.constant 0 : i32
    %20 = arith.cmpi ne, %19, %c0_i32_14 : i32
    scf.if %20 {
      %c0_15 = arith.constant 0 : index
      %c0_16 = arith.constant 0 : index
      %21 = vector.load %arg8[%c0_15, %c0_16] : memref<8x128xf32, #tpu.memory_space<vmem>>, vector<8x128xf32>
      %cst_17 = arith.constant dense<0.000000e+00> : vector<128xf32>
      %22 = vector.multi_reduction <add>, %21, %cst_17 [0] : vector<8x128xf32> to vector<128xf32>
      %23 = vector.shape_cast %22 : vector<128xf32> to vector<1x128xf32>
      %24 = vector.shape_cast %23 : vector<1x128xf32> to vector<1x1x128xf32>
      %c0_18 = arith.constant 0 : index
      %c0_19 = arith.constant 0 : index
      %c0_20 = arith.constant 0 : index
      %25 = vector.load %arg7[%c0_18, %c0_19, %c0_20] : memref<1x1x128xf32, #tpu.memory_space<vmem>>, vector<1x1x128xf32>
      tpu.vector_store %arg7[%c0_18, %c0_19, %c0_20], %24 {strides = array<i32>} : memref<1x1x128xf32, #tpu.memory_space<vmem>>, vector<1x1x128xf32>,
    } else {
    }
    return
  }
  func.func @transform_0(%arg0: i32, %arg1: i32) -> (i32, i32) {
    %c1_i32 = arith.constant 1 : i32
    %0 = arith.muli %arg0, %c1_i32 : i32
    %1 = arith.addi %0, %arg1 : i32
    %c0_i32 = arith.constant 0 : i32
    %c0_i32_0 = arith.constant 0 : i32
    return %1, %c0_i32 : i32, i32
  }
  func.func @transform_1(%arg0: i32, %arg1: i32) -> (i32, i32) {
    %c0_i32 = arith.constant 0 : i32
    %c0_i32_0 = arith.constant 0 : i32
    %c0_i32_1 = arith.constant 0 : i32
    return %c0_i32, %c0_i32_0 : i32, i32
  }
  func.func @transform_2(%arg0: i32, %arg1: i32) -> (i32, i32) {
    %c0_i32 = arith.constant 0 : i32
    %c0_i32_0 = arith.constant 0 : i32
    %c0_i32_1 = arith.constant 0 : i32
    return %c0_i32, %c0_i32_0 : i32, i32
  }
  func.func @transform_3(%arg0: i32, %arg1: i32) -> (i32, i32) {
    %c1_i32 = arith.constant 1 : i32
    %0 = arith.muli %arg0, %c1_i32 : i32
    %1 = arith.addi %0, %arg1 : i32
    %c0_i32 = arith.constant 0 : i32
    %c0_i32_0 = arith.constant 0 : i32
    return %1, %c0_i32 : i32, i32
  }
  func.func @transform_4(%arg0: i32, %arg1: i32) -> (i32, i32) {
    %c0_i32 = arith.constant 0 : i32
    %c0_i32_0 = arith.constant 0 : i32
    %c0_i32_1 = arith.constant 0 : i32
    return %c0_i32, %c0_i32_0 : i32, i32
  }
  func.func @transform_5(%arg0: i32, %arg1: i32) -> (i32, i32, i32) {
    %c0_i32 = arith.constant 0 : i32
    %c0_i32_0 = arith.constant 0 : i32
    %c0_i32_1 = arith.constant 0 : i32
    return %arg0, %c0_i32, %c0_i32_0 : i32, i32, i32
  }
}

module attributes {stable_mosaic.version = 11 : i64} {
  func.func @masked_mae_kernel(%arg0: i32, %arg1: i32, %arg2: memref<8x128xf32, #tpu.memory_space<vmem>>, %arg3: memref<128x128xf32, #tpu.memory_space<vmem>>, %arg4: memref<1x128xf32, #tpu.memory_space<vmem>>, %arg5: memref<8x8xbf16, #tpu.memory_space<vmem>>, %arg6: memref<8x128xbf16, #tpu.memory_space<vmem>>, %arg7: memref<1x1x128xf32, #tpu.memory_space<vmem>>, %arg8: memref<8x128xf32, #tpu.memory_space<vmem>>) attributes {dimension_semantics = [#tpu.dimension_semantics<parallel>, #tpu.dimension_semantics<arbitrary>], iteration_bounds = array<i64: 1, 1>, scalar_prefetch = 0 : i64, scratch_operands = 1 : i64, tpu.core_type = #tpu.core_type<tc>, window_params = [{transform_indices = @transform_0, window_bounds = array<i64: 8, 128>}, {pipeline_mode = #tpu.pipeline_mode<synchronous>, transform_indices = @transform_1, window_bounds = array<i64: 128, 128>}, {pipeline_mode = #tpu.pipeline_mode<synchronous>, transform_indices = @transform_2, window_bounds = array<i64: 1, 128>}, {transform_indices = @transform_3, window_bounds = array<i64: 8, 8>}, {pipeline_mode = #tpu.pipeline_mode<synchronous>, transform_indices = @transform_4, window_bounds = array<i64: 8, 128>}, {transform_indices = @transform_5, window_bounds = array<i64: 1, 1, 128>}]} {
    %c0 = arith.constant 0 : index
    %c0_0 = arith.constant 0 : index
    %0 = vector.load %arg2[%c0, %c0_0] : memref<8x128xf32, #tpu.memory_space<vmem>>, vector<8x128xf32>
    %c0_1 = arith.constant 0 : index
    %c0_2 = arith.constant 0 : index
    %1 = vector.load %arg3[%c0_1, %c0_2] : memref<128x128xf32, #tpu.memory_space<vmem>>, vector<128x128xf32>
    %cst = arith.constant dense<0.000000e+00> : vector<8x128xf32>
    %2 = tpu.matmul %0, %1, %cst {dimension_numbers = #tpu.dot_dimension_numbers<[1], [0], [0], [1], [0, 0, 1, 1], [], []>} : vector<8x128xf32>, vector<128x128xf32>, vector<8x128xf32> -> vector<8x128xf32>
    %c0_3 = arith.constant 0 : index
    %c0_4 = arith.constant 0 : index
    %3 = vector.load %arg4[%c0_3, %c0_4] : memref<1x128xf32, #tpu.memory_space<vmem>>, vector<1x128xf32>
    %4 = vector.broadcast %3 : vector<1x128xf32> to vector<8x128xf32>
    %5 = arith.addf %2, %4 : vector<8x128xf32>
    %6 = arith.subf %5, %0 : vector<8x128xf32>
    %c0_5 = arith.constant 0 : index
    %c0_6 = arith.constant 0 : index
    %7 = vector.load %arg5[%c0_5, %c0_6] : memref<8x8xbf16, #tpu.memory_space<vmem>>, vector<8x8xbf16>
    %c0_7 = arith.constant 0 : index
    %c0_8 = arith.constant 0 : index
    %8 = vector.load %arg6[%c0_7, %c0_8] : memref<8x128xbf16, #tpu.memory_space<vmem>>, vector<8x128xbf16>
    %cst_9 = arith.constant dense<0.000000e+00> : vector<8x128xf32>
    %9 = tpu.matmul %7, %8, %cst_9 {dimension_numbers = #tpu.dot_dimension_numbers<[1], [0], [0], [1], [0, 0, 1, 1], [], []>} : vector<8x8xbf16>, vector<8x128xbf16>, vector<8x128xf32> -> vector<8x128xf32>
    %10 = math.absf %6 : vector<8x128xf32>
    %11 = arith.mulf %10, %9 : vector<8x128xf32>
    %c0_i32 = arith.constant 0 : i32
    %12 = arith.cmpi eq, %arg1, %c0_i32 : i32
    %13 = arith.extui %12 : i1 to i32
    %c0_i32_10 = arith.constant 0 : i32
    %14 = arith.cmpi ne, %13, %c0_i32_10 : i32
    scf.if %14 {
      %c0_15 = arith.constant 0 : index
      %c0_16 = arith.constant 0 : index
      %21 = vector.load %arg8[%c0_15, %c0_16] : memref<8x128xf32, #tpu.memory_space<vmem>>, vector<8x128xf32>
      tpu.vector_store %arg8[%c0_15, %c0_16], %11 {strides = array<i32>} : memref<8x128xf32, #tpu.memory_space<vmem>>, vector<8x128xf32>,
    } else {
    }
    %c0_i32_11 = arith.constant 0 : i32
    %15 = arith.cmpi sgt, %arg1, %c0_i32_11 : i32
    %16 = arith.extui %15 : i1 to i32
    %c0_i32_12 = arith.constant 0 : i32
    %17 = arith.cmpi ne, %16, %c0_i32_12 : i32
    scf.if %17 {
      %c0_15 = arith.constant 0 : index
      %c0_16 = arith.constant 0 : index
      %21 = vector.load %arg8[%c0_15, %c0_16] : memref<8x128xf32, #tpu.memory_space<vmem>>, vector<8x128xf32>
      %22 = arith.addf %21, %11 : vector<8x128xf32>
      %c0_17 = arith.constant 0 : index
      %c0_18 = arith.constant 0 : index
      %23 = vector.load %arg8[%c0_17, %c0_18] : memref<8x128xf32, #tpu.memory_space<vmem>>, vector<8x128xf32>
      tpu.vector_store %arg8[%c0_17, %c0_18], %22 {strides = array<i32>} : memref<8x128xf32, #tpu.memory_space<vmem>>, vector<8x128xf32>,
    } else {
    }
    %c0_i32_13 = arith.constant 0 : i32
    %18 = arith.cmpi eq, %arg1, %c0_i32_13 : i32
    %19 = arith.extui %18 : i1 to i32
    %c0_i32_14 = arith.constant 0 : i32
    %20 = arith.cmpi ne, %19, %c0_i32_14 : i32
    scf.if %20 {
      %c0_15 = arith.constant 0 : index
      %c0_16 = arith.constant 0 : index
      %21 = vector.load %arg8[%c0_15, %c0_16] : memref<8x128xf32, #tpu.memory_space<vmem>>, vector<8x128xf32>
      %cst_17 = arith.constant dense<0.000000e+00> : vector<128xf32>
      %22 = vector.multi_reduction <add>, %21, %cst_17 [0] : vector<8x128xf32> to vector<128xf32>
      %23 = vector.shape_cast %22 : vector<128xf32> to vector<1x128xf32>
      %24 = vector.shape_cast %23 : vector<1x128xf32> to vector<1x1x128xf32>
      %c0_18 = arith.constant 0 : index
      %c0_19 = arith.constant 0 : index
      %c0_20 = arith.constant 0 : index
      %25 = vector.load %arg7[%c0_18, %c0_19, %c0_20] : memref<1x1x128xf32, #tpu.memory_space<vmem>>, vector<1x1x128xf32>
      tpu.vector_store %arg7[%c0_18, %c0_19, %c0_20], %24 {strides = array<i32>} : memref<1x1x128xf32, #tpu.memory_space<vmem>>, vector<1x1x128xf32>,
    } else {
    }
    return
  }
  func.func @transform_0(%arg0: i32, %arg1: i32) -> (i32, i32) {
    %c1_i32 = arith.constant 1 : i32
    %0 = arith.muli %arg0, %c1_i32 : i32
    %1 = arith.addi %0, %arg1 : i32
    %c0_i32 = arith.constant 0 : i32
    %c0_i32_0 = arith.constant 0 : i32
    return %1, %c0_i32 : i32, i32
  }
  func.func @transform_1(%arg0: i32, %arg1: i32) -> (i32, i32) {
    %c0_i32 = arith.constant 0 : i32
    %c0_i32_0 = arith.constant 0 : i32
    %c0_i32_1 = arith.constant 0 : i32
    return %c0_i32, %c0_i32_0 : i32, i32
  }
  func.func @transform_2(%arg0: i32, %arg1: i32) -> (i32, i32) {
    %c0_i32 = arith.constant 0 : i32
    %c0_i32_0 = arith.constant 0 : i32
    %c0_i32_1 = arith.constant 0 : i32
    return %c0_i32, %c0_i32_0 : i32, i32
  }
  func.func @transform_3(%arg0: i32, %arg1: i32) -> (i32, i32) {
    %c1_i32 = arith.constant 1 : i32
    %0 = arith.muli %arg0, %c1_i32 : i32
    %1 = arith.addi %0, %arg1 : i32
    %c0_i32 = arith.constant 0 : i32
    %c0_i32_0 = arith.constant 0 : i32
    return %1, %c0_i32 : i32, i32
  }
  func.func @transform_4(%arg0: i32, %arg1: i32) -> (i32, i32) {
    %c0_i32 = arith.constant 0 : i32
    %c0_i32_0 = arith.constant 0 : i32
    %c0_i32_1 = arith.constant 0 : i32
    return %c0_i32, %c0_i32_0 : i32, i32
  }
  func.func @transform_5(%arg0: i32, %arg1: i32) -> (i32, i32, i32) {
    %c0_i32 = arith.constant 0 : i32
    %c0_i32_0 = arith.constant 0 : i32
    %c0_i32_1 = arith.constant 0 : i32
    return %arg0, %c0_i32, %c0_i32_0 : i32, i32, i32
  }
}

</mosaic_0001>

<bundles_post_ra>
// kernel: tpu_custom_call.1
= control target key start
LH: loop header
LB: loop body
LE: loop exit
PB: predicated region body
PF: predicated region fallthrough
CT: control target
= control target key end

     0   :  { %10 = vsyncpa [#allocation4], 0  ;;  %s517_s0 = inlined_call_operand.hbm [shape: f32[8,128], index: 0, kind: input, shape index: {}]   ;;  %s518_s1 = inlined_call_operand.hbm [shape: f32[128,128], index: 1, kind: input, shape index: {}]   ;;  %s519_s2 = inlined_call_operand.vmem [shape: f32[1,128], index: 2, kind: input, shape index: {}]   ;;  %s520_s3 = inlined_call_operand.vmem [shape: bf16[8,8], index: 3, kind: input, shape index: {}]   ;;  %s521_s4 = inlined_call_operand.vmem [shape: bf16[8,128], index: 4, kind: input, shape index: {}]   ;;  %s522_s5 = inlined_call_operand.hbm [shape: f32[1,1,128], index: 5, kind: output, shape index: {}]  }
   0x1   :  { %11 = vsyncpa [#allocation7], 0 }
   0x2   :  { %12 = vsyncpa [#allocation5], 0  ;;  %s427_s18 = smov [#allocation3]   ;;  %s428_s20 = smov [#allocation6]  }
   0x3   :  { %s22_s19 = sshll.u32 %s427_s18, 4  ;;  %s31_s21 = sshll.u32 %s428_s20, 4  ;;  %s23_s19 = int_to_ptr.vmem [resolvable:$true] %s22_s19  ;;  %s465_s21 = int_to_ptr.vmem [resolvable:$true] %s31_s21 }
   0x4   :  { %s355_s24 = scalar_lea.hbm %s517_s0, 128 }
   0x5   :  { %p356_p0 = scmp.ne.s32.totalorder %s517_s0, %s355_s24  ;;  %p359_p1 = scmp.lt.u32.totalorder %s355_s24, %s517_s0 }
   0x7   :  { %p361_p2 = pnand %p359_p1, %p356_p0 }
   0x9   :  { %364 = shalt.err (!%p361_p2)
}
   0xa   :  { %s365_s29 = scalar_lea.vmem %s23_s19, 128  ;;  %p370_p4 = scmp.lt.s32.totalorder %s23_s19, %s23_s19 }
   0xb   :  { %p366_p3 = scmp.ne.s32.totalorder %s23_s19, %s365_s29  ;;  %p371_p5 = scmp.lt.s32.totalorder %s365_s29, %s365_s29 }
   0xd   :  { %p372_p6 = por %p371_p5, %p370_p4 }
   0xf   :  { %p373_p7 = pnand %p372_p6, %p366_p3 }
  0x11   :  { %376 = shalt.err (!%p373_p7)
}
  0x12   :  { %25 = dma.hbm_to_vmem [thread:$0]  %s517_s0, 128, %s23_s19, [#allocation4]  }
  0x13   :  { %s377_s9 = scalar_lea.hbm %s518_s1, 2048 }
  0x14   :  { %p378_p8 = scmp.ne.s32.totalorder %s518_s1, %s377_s9  ;;  %p381_p9 = scmp.lt.u32.totalorder %s377_s9, %s518_s1 }
  0x16   :  { %p383_p10 = pnand %p381_p9, %p378_p8 }
  0x18   :  { %386 = shalt.err (!%p383_p10)
}
  0x19   :  { %s387_s14 = scalar_lea.vmem %s465_s21, 2048  ;;  %p392_p12 = scmp.lt.s32.totalorder %s465_s21, %s465_s21 }
  0x1a   :  { %p388_p11 = scmp.ne.s32.totalorder %s465_s21, %s387_s14  ;;  %p393_p13 = scmp.lt.s32.totalorder %s387_s14, %s387_s14 }
  0x1c   :  { %p394_p0 = por %p393_p13, %p392_p12 }
  0x1e   :  { %p395_p1 = pnand %p394_p0, %p388_p11 }
  0x20   :  { %398 = shalt.err (!%p395_p1)
}
  0x21   :  { %s429_s0 = smov 128   ;;  %s430_s15 = smov 8  }
  0x22   :  { %37 = dma.hbm_to_vmem [thread:$0]  %s518_s1, 2048, %s465_s21, [#allocation7], %s429_s0, %s429_s0, %s430_s15  }
  0x23   :  { %421 = dma.done.wait [#allocation4], 128  }
  0x24   :  { %422 = vsyncadd [#allocation4], 4294967168 }
  0x25   :  { %423 = dma.done.wait [#allocation7], 2048  }
  0x26   :  { %424 = vsyncadd [#allocation7], 4294965248  ;;  %v431_v0 = vmov 0.0|0.0   ;;  %vm432_vm0 = vmmov 0   ;;  %v433_v1 = vmov 0.0   ;;  %v70_v2 = vld [vmem:[#allocation6] sm:$0xff] }
  0x27   :  { %323 = vmatprep.subr.bf16.mxu0 %v431_v0  ;;  %314 = vmatprep.mubr.msk.f32.mxu0 %vm432_vm0, %v433_v1  ;;  %v71_v3 = vld [vmem:[#allocation6 + $0x8] sm:$0xff]  ;;  %v72_v4 = vld [vmem:[#allocation6 + $0x10] sm:$0xff]  ;;  %v73_v6 = vld [vmem:[#allocation6 + $0x18] sm:$0xff]  ;;  %vm170_vm1 = vcmask 1043456   ;;  %vm166_vm2 = vcmask 64512   ;;  %s434_s21 = smov [#allocation8]  }
  0x28   :  { %317 = vmatprep.subr.bf16.mxu1 %v433_v1  ;;  %319 = vmatprep.mubr.msk.bf16.mxu1 %vm432_vm0, %v433_v1  ;;  %v324_v5 = vpack.c.bf16 %v71_v3, %v70_v2  ;;  %v327_v7 = vpack.c.bf16 %v73_v6, %v72_v4  ;;  %v74_v8 = vld [vmem:[#allocation6 + $0x20] sm:$0xff]  ;;  %v75_v9 = vld [vmem:[#allocation6 + $0x28] sm:$0xff]  ;;  %v165_v10 = vld [vmem:[%s521_s4] sm:$0xf]  ;;  %s245_s22 = sshll.u32 %s434_s21, 4  ;;  %s246_s22 = int_to_ptr.vmem [resolvable:$true] %s245_s22 }
  0x29   :  { %v172_v11 = vsel %vm170_vm1, %v165_v10, 0  ;;  %v330_v12 = vpack.c.bf16 %v75_v9, %v74_v8  ;;  %v164_v13 = vld [vmem:[%s520_s3] sm:$0xf]  ;;  %v76_v14 = vld [vmem:[#allocation6 + $0x30] sm:$0xff]  ;;  %v78_v17 = vld [vmem:[#allocation6 + $0x40] sm:$0xff]  ;;  %s399_s23 = scalar_lea.vmem %s246_s22, 16  ;;  %p404_p3 = scmp.lt.s32.totalorder %s246_s22, %s246_s22 }
  0x2a   :  { %325 = vmatpush3.bf16.msra.mxu0 %v324_v5  ;;  %318 = vmatpush3.bf16.msra.mxu1 %v172_v11  ;;  %v77_v15 = vld [vmem:[#allocation6 + $0x38] sm:$0xff]  ;;  %v79_v18 = vld [vmem:[#allocation6 + $0x48] sm:$0xff]  ;;  %v80_v20 = vld [vmem:[#allocation6 + $0x50] sm:$0xff]  ;;  %p400_p2 = scmp.ne.s32.totalorder %s246_s22, %s399_s23  ;;  %s403_s24 = scalar_lea.vmem %s246_s22, 32 }
  0x2b   :  { %326 = vmatprep.subr.bf16.mxu0 %v431_v0  ;;  %v333_v16 = vpack.c.bf16 %v77_v15, %v76_v14  ;;  %v336_v19 = vpack.c.bf16 %v79_v18, %v78_v17  ;;  %v81_v21 = vld [vmem:[#allocation6 + $0x58] sm:$0xff]  ;;  %v82_v23 = vld [vmem:[#allocation6 + $0x60] sm:$0xff]  ;;  %v83_v24 = vld [vmem:[#allocation6 + $0x68] sm:$0xff]  ;;  %p405_p4 = scmp.lt.s32.totalorder %s403_s24, %s399_s23 }
  0x2c   :  { %v339_v22 = vpack.c.bf16 %v81_v21, %v80_v20  ;;  %v342_v25 = vpack.c.bf16 %v83_v24, %v82_v23  ;;  %v84_v26 = vld [vmem:[#allocation6 + $0x70] sm:$0xff]  ;;  %v85_v27 = vld [vmem:[#allocation6 + $0x78] sm:$0xff] }
  0x2d   :  { %320 = vmatmul.mubr.msk.bf16.vlgmr.msra.gmra.mrb[0].mxu1 %vm166_vm2, %v164_v13  ;;  %v345_v28 = vpack.c.bf16 %v85_v27, %v84_v26  ;;  %v69_v29 = vld [vmem:[#allocation3] sm:$0xff]  ;;  %p406_p5 = por %p405_p4, %p404_p3 }
  0x2e   :  { %328 = vmatpush3.bf16.msra.mxu0 %v327_v7  ;;  %v261_v34 = vld [vmem:[%s519_s2] ss:$0 sm:$0xff] }
  0x2f   :  { %329 = vmatprep.subr.bf16.mxu0 %v431_v0  ;;  %p407_p6 = pnand %p406_p5, %p400_p2 }
  0x32   :  { %331 = vmatpush3.bf16.msra.mxu0 %v330_v12 }
  0x33   :  { %332 = vmatprep.subr.bf16.mxu0 %v431_v0 }
  0x36   :  { %334 = vmatpush3.bf16.msra.mxu0 %v333_v16 }
  0x37   :  { %335 = vmatprep.subr.bf16.mxu0 %v431_v0 }
  0x3a   :  { %337 = vmatpush3.bf16.msra.mxu0 %v336_v19 }
  0x3b   :  { %338 = vmatprep.subr.bf16.mxu0 %v431_v0 }
  0x3e   :  { %340 = vmatpush3.bf16.msra.mxu0 %v339_v22 }
  0x3f   :  { %341 = vmatprep.subr.bf16.mxu0 %v431_v0 }
  0x42   :  { %343 = vmatpush3.bf16.msra.mxu0 %v342_v25 }
  0x43   :  { %344 = vmatprep.subr.bf16.mxu0 %v431_v0 }
  0x46   :  { %346 = vmatpush3.bf16.msra.mxu0 %v345_v28 }
  0x49   :  { %315 = vmatmul.mubr.f32.vlgmr.msra.gmra.mrb[0].mxu0 %v69_v29 }
 0x100   :  { %v208_v30 = vpop.f32.mrb[0].mxu1 }
 0x101   :  { %v321_v31 = vpop.f32.mrb[1].mxu1 }
 0x102   :  { %v211_v32 = vpop.f32.mrb[2].mxu1 }
 0x103   :  { %v322_v33 = vpop.f32.mrb[3].mxu1 }
 0x11c   :  { %v159_v35 = vpop.f32.mrb[0].mxu0 }
 0x11d   :  { %v160_v36 = vadd.f32 %v261_v34, %v159_v35  ;;  %v316_v37 = vpop.f32.mrb[1].mxu0 }
 0x11f   :  { %v163_v38 = vsub.f32 %v160_v36, %v69_v29 }
 0x121   :  { %v214_v39 = vand.u32 2147483647, %v163_v38 }
 0x123   :  { %v215_v40 = vmul.f32 %v214_v39, %v208_v30 }
 0x125   :  { %v232_v41 = vrot.slane %v215_v40, 4 }
 0x127   :  { %v233_v42 = vadd.f32 %v232_v41, %v215_v40 }
 0x129   :  { %v234_v43 = vrot.slane %v233_v42, 2 }
 0x12b   :  { %v235_v44 = vadd.f32 %v234_v43, %v233_v42 }
 0x12d   :  { %v236_v45 = vrot.slane %v235_v44, 1 }
 0x12f   :  { %v237_v46 = vadd.f32 %v236_v45, %v235_v44 }
 0x131   :  { %238 = vst [vmem:[#allocation8] sm:$0x1] %v237_v46 }
 0x132   :  { %410 = shalt.err (!%p407_p6)
}
 0x133   :  { %s411_s26 = scalar_lea.hbm %s522_s5, 16 }
 0x134   :  { %p412_p7 = scmp.ne.s32.totalorder %s522_s5, %s411_s26  ;;  %p415_p8 = scmp.lt.u32.totalorder %s411_s26, %s522_s5 }
 0x136   :  { %p417_p9 = pnand %p415_p8, %p412_p7 }
 0x138   :  { %420 = shalt.err (!%p417_p9)
}
 0x139   :  { %248 = dma.vmem_to_hbm [thread:$0]  %s246_s22, 16, %s522_s5, [#allocation5]  }
 0x13a   :  { %425 = dma.done.wait [#allocation5], 16  }
 0x13b   :  { %426 = vsyncadd [#allocation5], 4294967280 }
 0x13c   :  { %252 = vsyncpa [#allocation4], 1 }
 0x13d   :  { %253 = vsyncpa [#allocation7], 1 }
 0x13e   :  { %254 = vsyncpa [#allocation5], 1 }

// kernel: tpu_custom_call.1
= control target key start
LH: loop header
LB: loop body
LE: loop exit
PB: predicated region body
PF: predicated region fallthrough
CT: control target
= control target key end

     0   :  { %10 = vsyncpa [#allocation4], 0  ;;  %s517_s0 = inlined_call_operand.hbm [shape: f32[8,128], index: 0, kind: input, shape index: {}]   ;;  %s518_s1 = inlined_call_operand.hbm [shape: f32[128,128], index: 1, kind: input, shape index: {}]   ;;  %s519_s2 = inlined_call_operand.vmem [shape: f32[1,128], index: 2, kind: input, shape index: {}]   ;;  %s520_s3 = inlined_call_operand.vmem [shape: bf16[8,8], index: 3, kind: input, shape index: {}]   ;;  %s521_s4 = inlined_call_operand.vmem [shape: bf16[8,128], index: 4, kind: input, shape index: {}]   ;;  %s522_s5 = inlined_call_operand.hbm [shape: f32[1,1,128], index: 5, kind: output, shape index: {}]  }
   0x1   :  { %11 = vsyncpa [#allocation7], 0 }
   0x2   :  { %12 = vsyncpa [#allocation5], 0  ;;  %s427_s18 = smov [#allocation3]   ;;  %s428_s20 = smov [#allocation6]  }
   0x3   :  { %s22_s19 = sshll.u32 %s427_s18, 4  ;;  %s31_s21 = sshll.u32 %s428_s20, 4  ;;  %s23_s19 = int_to_ptr.vmem [resolvable:$true] %s22_s19  ;;  %s465_s21 = int_to_ptr.vmem [resolvable:$true] %s31_s21 }
   0x4   :  { %s355_s24 = scalar_lea.hbm %s517_s0, 128 }
   0x5   :  { %p356_p0 = scmp.ne.s32.totalorder %s517_s0, %s355_s24  ;;  %p359_p1 = scmp.lt.u32.totalorder %s355_s24, %s517_s0 }
   0x7   :  { %p361_p2 = pnand %p359_p1, %p356_p0 }
   0x9   :  { %364 = shalt.err (!%p361_p2)
}
   0xa   :  { %s365_s29 = scalar_lea.vmem %s23_s19, 128  ;;  %p370_p4 = scmp.lt.s32.totalorder %s23_s19, %s23_s19 }
   0xb   :  { %p366_p3 = scmp.ne.s32.totalorder %s23_s19, %s365_s29  ;;  %p371_p5 = scmp.lt.s32.totalorder %s365_s29, %s365_s29 }
   0xd   :  { %p372_p6 = por %p371_p5, %p370_p4 }
   0xf   :  { %p373_p7 = pnand %p372_p6, %p366_p3 }
  0x11   :  { %376 = shalt.err (!%p373_p7)
}
  0x12   :  { %25 = dma.hbm_to_vmem [thread:$0]  %s517_s0, 128, %s23_s19, [#allocation4]  }
  0x13   :  { %s377_s9 = scalar_lea.hbm %s518_s1, 2048 }
  0x14   :  { %p378_p8 = scmp.ne.s32.totalorder %s518_s1, %s377_s9  ;;  %p381_p9 = scmp.lt.u32.totalorder %s377_s9, %s518_s1 }
  0x16   :  { %p383_p10 = pnand %p381_p9, %p378_p8 }
  0x18   :  { %386 = shalt.err (!%p383_p10)
}
  0x19   :  { %s387_s14 = scalar_lea.vmem %s465_s21, 2048  ;;  %p392_p12 = scmp.lt.s32.totalorder %s465_s21, %s465_s21 }
  0x1a   :  { %p388_p11 = scmp.ne.s32.totalorder %s465_s21, %s387_s14  ;;  %p393_p13 = scmp.lt.s32.totalorder %s387_s14, %s387_s14 }
  0x1c   :  { %p394_p0 = por %p393_p13, %p392_p12 }
  0x1e   :  { %p395_p1 = pnand %p394_p0, %p388_p11 }
  0x20   :  { %398 = shalt.err (!%p395_p1)
}
  0x21   :  { %s429_s0 = smov 128   ;;  %s430_s15 = smov 8  }
  0x22   :  { %37 = dma.hbm_to_vmem [thread:$0]  %s518_s1, 2048, %s465_s21, [#allocation7], %s429_s0, %s429_s0, %s430_s15  }
  0x23   :  { %421 = dma.done.wait [#allocation4], 128  }
  0x24   :  { %422 = vsyncadd [#allocation4], 4294967168 }
  0x25   :  { %423 = dma.done.wait [#allocation7], 2048  }
  0x26   :  { %424 = vsyncadd [#allocation7], 4294965248  ;;  %v431_v0 = vmov 0.0|0.0   ;;  %vm432_vm0 = vmmov 0   ;;  %v433_v1 = vmov 0.0   ;;  %v70_v2 = vld [vmem:[#allocation6] sm:$0xff] }
  0x27   :  { %323 = vmatprep.subr.bf16.mxu0 %v431_v0  ;;  %314 = vmatprep.mubr.msk.f32.mxu0 %vm432_vm0, %v433_v1  ;;  %v71_v3 = vld [vmem:[#allocation6 + $0x8] sm:$0xff]  ;;  %v72_v4 = vld [vmem:[#allocation6 + $0x10] sm:$0xff]  ;;  %v73_v6 = vld [vmem:[#allocation6 + $0x18] sm:$0xff]  ;;  %vm170_vm1 = vcmask 1043456   ;;  %vm166_vm2 = vcmask 64512   ;;  %s434_s21 = smov [#allocation8]  }
  0x28   :  { %317 = vmatprep.subr.bf16.mxu1 %v433_v1  ;;  %319 = vmatprep.mubr.msk.bf16.mxu1 %vm432_vm0, %v433_v1  ;;  %v324_v5 = vpack.c.bf16 %v71_v3, %v70_v2  ;;  %v327_v7 = vpack.c.bf16 %v73_v6, %v72_v4  ;;  %v74_v8 = vld [vmem:[#allocation6 + $0x20] sm:$0xff]  ;;  %v75_v9 = vld [vmem:[#allocation6 + $0x28] sm:$0xff]  ;;  %v165_v10 = vld [vmem:[%s521_s4] sm:$0xf]  ;;  %s245_s22 = sshll.u32 %s434_s21, 4  ;;  %s246_s22 = int_to_ptr.vmem [resolvable:$true] %s245_s22 }
  0x29   :  { %v172_v11 = vsel %vm170_vm1, %v165_v10, 0  ;;  %v330_v12 = vpack.c.bf16 %v75_v9, %v74_v8  ;;  %v164_v13 = vld [vmem:[%s520_s3] sm:$0xf]  ;;  %v76_v14 = vld [vmem:[#allocation6 + $0x30] sm:$0xff]  ;;  %v78_v17 = vld [vmem:[#allocation6 + $0x40] sm:$0xff]  ;;  %s399_s23 = scalar_lea.vmem %s246_s22, 16  ;;  %p404_p3 = scmp.lt.s32.totalorder %s246_s22, %s246_s22 }
  0x2a   :  { %325 = vmatpush3.bf16.msra.mxu0 %v324_v5  ;;  %318 = vmatpush3.bf16.msra.mxu1 %v172_v11  ;;  %v77_v15 = vld [vmem:[#allocation6 + $0x38] sm:$0xff]  ;;  %v79_v18 = vld [vmem:[#allocation6 + $0x48] sm:$0xff]  ;;  %v80_v20 = vld [vmem:[#allocation6 + $0x50] sm:$0xff]  ;;  %p400_p2 = scmp.ne.s32.totalorder %s246_s22, %s399_s23  ;;  %s403_s24 = scalar_lea.vmem %s246_s22, 32 }
  0x2b   :  { %326 = vmatprep.subr.bf16.mxu0 %v431_v0  ;;  %v333_v16 = vpack.c.bf16 %v77_v15, %v76_v14  ;;  %v336_v19 = vpack.c.bf16 %v79_v18, %v78_v17  ;;  %v81_v21 = vld [vmem:[#allocation6 + $0x58] sm:$0xff]  ;;  %v82_v23 = vld [vmem:[#allocation6 + $0x60] sm:$0xff]  ;;  %v83_v24 = vld [vmem:[#allocation6 + $0x68] sm:$0xff]  ;;  %p405_p4 = scmp.lt.s32.totalorder %s403_s24, %s399_s23 }
  0x2c   :  { %v339_v22 = vpack.c.bf16 %v81_v21, %v80_v20  ;;  %v342_v25 = vpack.c.bf16 %v83_v24, %v82_v23  ;;  %v84_v26 = vld [vmem:[#allocation6 + $0x70] sm:$0xff]  ;;  %v85_v27 = vld [vmem:[#allocation6 + $0x78] sm:$0xff] }
  0x2d   :  { %320 = vmatmul.mubr.msk.bf16.vlgmr.msra.gmra.mrb[0].mxu1 %vm166_vm2, %v164_v13  ;;  %v345_v28 = vpack.c.bf16 %v85_v27, %v84_v26  ;;  %v69_v29 = vld [vmem:[#allocation3] sm:$0xff]  ;;  %p406_p5 = por %p405_p4, %p404_p3 }
  0x2e   :  { %328 = vmatpush3.bf16.msra.mxu0 %v327_v7  ;;  %v261_v34 = vld [vmem:[%s519_s2] ss:$0 sm:$0xff] }
  0x2f   :  { %329 = vmatprep.subr.bf16.mxu0 %v431_v0  ;;  %p407_p6 = pnand %p406_p5, %p400_p2 }
  0x32   :  { %331 = vmatpush3.bf16.msra.mxu0 %v330_v12 }
  0x33   :  { %332 = vmatprep.subr.bf16.mxu0 %v431_v0 }
  0x36   :  { %334 = vmatpush3.bf16.msra.mxu0 %v333_v16 }
  0x37   :  { %335 = vmatprep.subr.bf16.mxu0 %v431_v0 }
  0x3a   :  { %337 = vmatpush3.bf16.msra.mxu0 %v336_v19 }
  0x3b   :  { %338 = vmatprep.subr.bf16.mxu0 %v431_v0 }
  0x3e   :  { %340 = vmatpush3.bf16.msra.mxu0 %v339_v22 }
  0x3f   :  { %341 = vmatprep.subr.bf16.mxu0 %v431_v0 }
  0x42   :  { %343 = vmatpush3.bf16.msra.mxu0 %v342_v25 }
  0x43   :  { %344 = vmatprep.subr.bf16.mxu0 %v431_v0 }
  0x46   :  { %346 = vmatpush3.bf16.msra.mxu0 %v345_v28 }
  0x49   :  { %315 = vmatmul.mubr.f32.vlgmr.msra.gmra.mrb[0].mxu0 %v69_v29 }
 0x100   :  { %v208_v30 = vpop.f32.mrb[0].mxu1 }
 0x101   :  { %v321_v31 = vpop.f32.mrb[1].mxu1 }
 0x102   :  { %v211_v32 = vpop.f32.mrb[2].mxu1 }
 0x103   :  { %v322_v33 = vpop.f32.mrb[3].mxu1 }
 0x11c   :  { %v159_v35 = vpop.f32.mrb[0].mxu0 }
 0x11d   :  { %v160_v36 = vadd.f32 %v261_v34, %v159_v35  ;;  %v316_v37 = vpop.f32.mrb[1].mxu0 }
 0x11f   :  { %v163_v38 = vsub.f32 %v160_v36, %v69_v29 }
 0x121   :  { %v214_v39 = vand.u32 2147483647, %v163_v38 }
 0x123   :  { %v215_v40 = vmul.f32 %v214_v39, %v208_v30 }
 0x125   :  { %v232_v41 = vrot.slane %v215_v40, 4 }
 0x127   :  { %v233_v42 = vadd.f32 %v232_v41, %v215_v40 }
 0x129   :  { %v234_v43 = vrot.slane %v233_v42, 2 }
 0x12b   :  { %v235_v44 = vadd.f32 %v234_v43, %v233_v42 }
 0x12d   :  { %v236_v45 = vrot.slane %v235_v44, 1 }
 0x12f   :  { %v237_v46 = vadd.f32 %v236_v45, %v235_v44 }
 0x131   :  { %238 = vst [vmem:[#allocation8] sm:$0x1] %v237_v46 }
 0x132   :  { %410 = shalt.err (!%p407_p6)
}
 0x133   :  { %s411_s26 = scalar_lea.hbm %s522_s5, 16 }
 0x134   :  { %p412_p7 = scmp.ne.s32.totalorder %s522_s5, %s411_s26  ;;  %p415_p8 = scmp.lt.u32.totalorder %s411_s26, %s522_s5 }
 0x136   :  { %p417_p9 = pnand %p415_p8, %p412_p7 }
 0x138   :  { %420 = shalt.err (!%p417_p9)
}
 0x139   :  { %248 = dma.vmem_to_hbm [thread:$0]  %s246_s22, 16, %s522_s5, [#allocation5]  }
 0x13a   :  { %425 = dma.done.wait [#allocation5], 16  }
 0x13b   :  { %426 = vsyncadd [#allocation5], 4294967280 }
 0x13c   :  { %252 = vsyncpa [#allocation4], 1 }
 0x13d   :  { %253 = vsyncpa [#allocation7], 1 }
 0x13e   :  { %254 = vsyncpa [#allocation5], 1 }

</bundles_post_ra>
